<compile_context>
chip_gen: v5e
topology: v5e:2x2
jax: 0.10.0
libtpu: 0.0.40
codegen_flags: <defaults>
</compile_context>

<pallas_src>
import jax
import jax.numpy as jnp
from jax.experimental import pallas as pl
from jax.experimental.pallas import tpu as pltpu

_LANE_CANDIDATES = (1024, 512, 256, 128)   # lane-dense widths (multiples of 128)
_TARGET_BLOCK_BYTES = 2 * 1024 * 1024      # ~2 MiB blocks: VMEM-safe on v5e/v6e/v7x


def _copy_kernel(x_ref, o_ref):
    # Identity copy of the current lane-dense tile.
    o_ref[...] = x_ref[...]


def _pallas_identity_copy(x_1d):
    """Tiled, pipelined identity copy of a flat 1-D array through VMEM."""
    total = x_1d.shape[0]
    itemsize = jnp.dtype(x_1d.dtype).itemsize

    # Pick the widest lane width (multiple of 128) that divides the total;
    # otherwise fall back to a single full-extent block (exempt from the
    # (8, 128) divisibility rule).
    lane = None
    for cand in _LANE_CANDIDATES:
        if total % cand == 0:
            lane = cand
            break
    if lane is None:
        lane = total

    rows = total // lane

    if rows <= 8:
        block_rows = rows                      # full sublane extent (allowed)
    else:
        block_rows = (_TARGET_BLOCK_BYTES // (lane * itemsize)) // 8 * 8
        block_rows = max(8, min(block_rows, rows))

    grid = pl.cdiv(rows, block_rows)
    x_2d = x_1d.reshape(rows, lane)

    y_2d = pl.pallas_call(
        _copy_kernel,
        out_shape=jax.ShapeDtypeStruct((rows, lane), x_1d.dtype),
        grid_spec=pltpu.PrefetchScalarGridSpec(
            num_scalar_prefetch=0,
            grid=(grid,),
            in_specs=[pl.BlockSpec((block_rows, lane), lambda i: (i, 0))],
            out_specs=pl.BlockSpec((block_rows, lane), lambda i: (i, 0)),
        ),
        compiler_params=pltpu.CompilerParams(
            dimension_semantics=("parallel",)),   # shards across v7x's 2 TCs
        input_output_aliases={0: 0},              # same bytes in/out: reuse HBM
        cost_estimate=pl.CostEstimate(
            flops=0, transcendentals=0,
            bytes_accessed=2 * total * itemsize),
    )(x_2d)

    return y_2d.reshape(total)


def reshape_forward(x, target_shape, *, use_pallas_copy=True):
    """Pallas equivalent of Reshape(shape=target_shape)(x).

    Matches torch.Tensor.view semantics (row-major reinterpretation):
    output shape is (x.shape[0], *target_shape).
    """
    B = x.shape[0]
    feat = 1
    for d in x.shape[1:]:
        feat *= d

    out_feat = 1
    for d in target_shape:
        out_feat *= d
    assert feat == out_feat, (
        f"cannot view {x.shape} as ({B}, {tuple(target_shape)}): "
        f"{feat} != {out_feat}")

    out_shape = (B,) + tuple(target_shape)

    if not use_pallas_copy:
        # Metadata-only path: the real-world optimum (no HBM traffic at all).
        return x.reshape(out_shape)

    # Hot path: lane-dense, tiled, pipelined identity copy through Pallas.
    x_1d = x.reshape(B * feat)
    y_1d = _pallas_identity_copy(x_1d)
    return y_1d.reshape(out_shape)


if __name__ == "__main__":
    key = jax.random.PRNGKey(0)
    # Typical use inside resnet_simclr: flatten a conv feature map
    # (B, C, H, W) -> (B, C*H*W).
    B, C, H, W = 2, 4, 16, 16
    x = jax.random.normal(key, (B, C, H, W), dtype=jnp.float32)

    # Reshape(shape=[1024])
    target_shape = [C * H * W]
    y = jax.block_until_ready(reshape_forward(x, target_shape))
    y_ref = x.reshape(B, *target_shape)
    assert y.shape == (B, C * H * W)
    assert y.dtype == x.dtype
    assert bool(jnp.array_equal(y, y_ref))

    # Multi-dim target shape, e.g. Reshape(shape=[64, 16]).
    y2 = jax.block_until_ready(reshape_forward(x, [64, 16]))
    assert y2.shape == (B, 64, 16)
    assert bool(jnp.array_equal(y2, x.reshape(B, 64, 16)))

    # Metadata-only fast path (the recommended production path).
    y3 = jax.block_until_ready(
        reshape_forward(x, target_shape, use_pallas_copy=False))
    assert bool(jnp.array_equal(y3, y_ref))

    print("KERNEL_OK")
</pallas_src>

<mosaic_0001>
module attributes {stable_mosaic.version = 11 : i64} {
  func.func @_copy_kernel(%arg0: i32, %arg1: memref<2x1024xf32, #tpu.memory_space<vmem>>, %arg2: memref<2x1024xf32, #tpu.memory_space<vmem>>) attributes {dimension_semantics = [#tpu.dimension_semantics<parallel>], iteration_bounds = array<i64: 1>, scalar_prefetch = 0 : i64, scratch_operands = 0 : i64, tpu.core_type = #tpu.core_type<tc>, window_params = [{transform_indices = @transform_0, window_bounds = array<i64: 2, 1024>}, {transform_indices = @transform_1, window_bounds = array<i64: 2, 1024>}]} {
    %c0 = arith.constant 0 : index
    %c0_0 = arith.constant 0 : index
    %0 = vector.load %arg1[%c0, %c0_0] : memref<2x1024xf32, #tpu.memory_space<vmem>>, vector<2x1024xf32>
    %c0_1 = arith.constant 0 : index
    %c0_2 = arith.constant 0 : index
    %1 = vector.load %arg2[%c0_1, %c0_2] : memref<2x1024xf32, #tpu.memory_space<vmem>>, vector<2x1024xf32>
    tpu.vector_store %arg2[%c0_1, %c0_2], %0 {strides = array<i32>} : memref<2x1024xf32, #tpu.memory_space<vmem>>, vector<2x1024xf32>,
    return
  }
  func.func @transform_0(%arg0: i32) -> (i32, i32) {
    %c0_i32 = arith.constant 0 : i32
    %c0_i32_0 = arith.constant 0 : i32
    return %arg0, %c0_i32 : i32, i32
  }
  func.func @transform_1(%arg0: i32) -> (i32, i32) {
    %c0_i32 = arith.constant 0 : i32
    %c0_i32_0 = arith.constant 0 : i32
    return %arg0, %c0_i32 : i32, i32
  }
}

</mosaic_0001>

<bundles_post_ra>
// kernel: tpu_custom_call.1
= control target key start
LH: loop header
LB: loop body
LE: loop exit
PB: predicated region body
PF: predicated region fallthrough
CT: control target
= control target key end

     0   :  { %6 = vsyncpa [#allocation3], 0  ;;  %s116_s0 = inlined_call_operand.hbm [shape: f32[2,1024], index: 0, kind: input, shape index: {}, may-alias: {0,1}]   ;;  %s117_s1 = inlined_call_operand.hbm [shape: f32[2,1024], index: 1, kind: output, shape index: {}, may-alias: {0,1}]  }
   0x1   :  { %7 = vsyncpa [#allocation4], 0  ;;  %s13_s8 = sshll.u32 %s116_s0, 4  ;;  %s98_s9 = smov [#allocation2]   ;;  %s14_s8 = int_to_ptr.hbm [resolvable:$true] %s13_s8 }
   0x2   :  { %s15_s10 = sshll.u32 %s98_s9, 4  ;;  %s16_s10 = int_to_ptr.vmem [resolvable:$true] %s15_s10 }
   0x3   :  { %18 = dma.hbm_to_vmem [thread:$0]  %s14_s8, 256, %s16_s10, [#allocation3]  }
   0x4   :  { %94 = dma.done.wait [#allocation3], 256  }
   0x5   :  { %95 = vsyncadd [#allocation3], 4294967040  ;;  %s99_s11 = smov [#allocation5]   ;;  %s34_s15 = sshll.u32 %s117_s1, 4  ;;  %v23_v0 = vld [vmem:[#allocation2] sm:$0xff]  ;;  %v24_v1 = vld [vmem:[#allocation2 + $0x8] sm:$0xff]  ;;  %s35_s15 = int_to_ptr.hbm [resolvable:$true] %s34_s15 }
   0x6   :  { %s32_s12 = sshll.u32 %s99_s11, 4  ;;  %25 = vst [vmem:[#allocation5] sm:$0xff] %v23_v0  ;;  %s33_s12 = int_to_ptr.vmem [resolvable:$true] %s32_s12 }
   0x7   :  { %26 = vst [vmem:[#allocation5 + $0x8] sm:$0xff] %v24_v1 }
   0x8   :  { %37 = dma.vmem_to_hbm [thread:$0]  %s33_s12, 256, %s35_s15, [#allocation4]  }
   0x9   :  { %96 = dma.done.wait [#allocation4], 256  }
   0xa   :  { %97 = vsyncadd [#allocation4], 4294967040 }
   0xb   :  { %42 = vsyncpa [#allocation3], 1 }
   0xc   :  { %43 = vsyncpa [#allocation4], 1 }

</bundles_post_ra>
